<compile_context>
chip_gen: v6e
topology: v6e:2x2x1
jax: 0.10.0
libtpu: 0.0.40
codegen_flags: <defaults>
</compile_context>

<pallas_src>
import functools

import jax
import jax.numpy as jnp
from jax import lax
from jax.experimental import pallas as pl
from jax.experimental.pallas import tpu as pltpu

_NEG_INF = -1e30   # finite "-inf" (avoids inf-inf NaNs in the online softmax)
_LANE = 128        # TPU lane width
_SUBLANE = 8       # TPU sublane width


def _round_up(x, m):
    return ((x + m - 1) // m) * m


def _flash_kernel(q_ref, k_ref, v_ref, o_ref, m_ref, l_ref, acc_ref,
                  *, scale, sk, tk, need_mask):
    """One (query-tile, kv-tile) grid step of flash attention.

    Grid = (num_q_tiles, num_kv_tiles); the kv axis is the sequential
    reduction axis. Running max / running sum / f32 accumulator live in VMEM
    scratch and are carried across kv (output block index is kv-invariant).
    """
    kv = pl.program_id(1)

    # ---- init running stats at the first kv tile --------------------------
    @pl.when(kv == 0)
    def _init():
        m_ref[...] = jnp.full(m_ref.shape, _NEG_INF, dtype=m_ref.dtype)
        l_ref[...] = jnp.zeros(l_ref.shape, dtype=l_ref.dtype)
        acc_ref[...] = jnp.zeros(acc_ref.shape, dtype=acc_ref.dtype)

    # ---- scores: (tq, tk) on the MXU, K consumed untransposed -------------
    q = q_ref[...]
    if scale is not None:
        # Fold scale into the (tq, D) query tile: O(tq*D) instead of O(tq*tk).
        q = q * jnp.asarray(scale, dtype=q.dtype)
    s = lax.dot_general(q, k_ref[...], (((1,), (1,)), ((), ())),
                        preferred_element_type=jnp.float32)

    if need_mask:
        # Mask zero-padded key rows of the last kv tile.
        col = lax.broadcasted_iota(jnp.int32, s.shape, 1) + kv * tk
        s = jnp.where(col < sk, s, _NEG_INF)

    # ---- online softmax update ---------------------------------------------
    m_prev = m_ref[...]                                    # (tq, 128), lanes equal
    l_prev = l_ref[...]
    m_curr = jnp.max(s, axis=-1, keepdims=True)            # (tq, 1)
    m_next = jnp.maximum(m_prev, m_curr)                   # (tq, 128)
    alpha = jnp.exp(m_prev - m_next)                       # rescale of old stats
    p = jnp.exp(s - m_next[:, 0:1])                        # (tq, tk)
    l_ref[...] = alpha * l_prev + jnp.sum(p, axis=-1, keepdims=True)
    m_ref[...] = m_next

    # PV matmul: probabilities cast to V's native dtype, f32 accumulation.
    acc_ref[...] = acc_ref[...] * alpha[:, 0:1] + jnp.dot(
        p.astype(v_ref.dtype), v_ref[...], preferred_element_type=jnp.float32)

    # ---- finalize on the last kv tile --------------------------------------
    @pl.when(kv == pl.num_programs(1) - 1)
    def _finalize():
        # dropout(p=0.0) is the identity in this module's default config.
        inv_l = pl.reciprocal(l_ref[...][:, 0:1], approx=True)   # EUP slot
        o_ref[...] = (acc_ref[...] * inv_l).astype(o_ref.dtype)


def scaled_dot_product_attention(q, k, v, scale=None, attn_mask=None,
                                 *, tq_max=128, tk_max=512):
    """Flash-attention equivalent of ScaledDotProductAttention.forward.

    q: (Sq, D), k: (Sk, D), v: (Sk, Dv) -> (Sq, Dv).
    Tile caps (tq<=128, tk<=512) are sized for the 32 MiB default scoped VMEM
    so the same budget also fits v7x's 64 MiB physical VMEM.
    """
    if attn_mask is not None:
        # TODO(synk): attn_mask (masked_fill) path not implemented; module default is None.
        raise NotImplementedError("attn_mask is not supported")

    sq, d = q.shape
    sk, dk = k.shape
    skv, dv = v.shape
    assert d == dk and sk == skv

    # Tile sizes: sublane-aligned rows, lane-dense (128-padded) last dims.
    tq = min(tq_max, _round_up(sq, _SUBLANE))
    tk = min(tk_max, _round_up(sk, _SUBLANE))
    sq_p = _round_up(sq, tq)
    sk_p = _round_up(sk, tk)
    d_p = _round_up(d, _LANE)
    dv_p = _round_up(dv, _LANE)

    # Zero-pad: zeros in the contraction dim are exact; padded key rows are
    # masked inside the kernel; padded query rows / Dv columns are sliced off.
    q_p = jnp.pad(q, ((0, sq_p - sq), (0, d_p - d)))
    k_p = jnp.pad(k, ((0, sk_p - sk), (0, d_p - d)))
    v_p = jnp.pad(v, ((0, sk_p - sk), (0, dv_p - dv)))

    grid = (sq_p // tq, sk_p // tk)
    kernel = functools.partial(
        _flash_kernel, scale=scale, sk=sk, tk=tk, need_mask=(sk_p != sk))

    itemsize = jnp.dtype(q.dtype).itemsize
    cost = pl.CostEstimate(
        flops=2 * sq * sk * (d + dv),
        transcendentals=sq * sk,
        bytes_accessed=itemsize * (sq * d + sk * d + sk * dv + sq * dv),
    )

    out_p = pl.pallas_call(
        kernel,
        out_shape=jax.ShapeDtypeStruct((sq_p, dv_p), q.dtype),
        grid=grid,
        in_specs=[
            pl.BlockSpec((tq, d_p), lambda i, j: (i, 0)),
            pl.BlockSpec((tk, d_p), lambda i, j: (j, 0)),
            pl.BlockSpec((tk, dv_p), lambda i, j: (j, 0)),
        ],
        out_specs=pl.BlockSpec((tq, dv_p), lambda i, j: (i, 0)),
        scratch_shapes=[
            pltpu.VMEM((tq, _LANE), jnp.float32),   # running max m
            pltpu.VMEM((tq, _LANE), jnp.float32),   # running sum l
            pltpu.VMEM((tq, dv_p), jnp.float32),    # f32 output accumulator
        ],
        compiler_params=pltpu.CompilerParams(
            dimension_semantics=("parallel", "arbitrary")),
        cost_estimate=cost,
    )(q_p, k_p, v_p)

    return out_p[:sq, :dv]


def _reference(q, k, v, scale=None):
    s = jnp.matmul(q.astype(jnp.float32), k.astype(jnp.float32).T)
    if scale is not None:
        s = s * scale
    attn = jax.nn.softmax(s, axis=-1)
    return jnp.matmul(attn, v.astype(jnp.float32)).astype(q.dtype)


if __name__ == "__main__":
    keys = jax.random.split(jax.random.PRNGKey(0), 6)

    # --- primary case: shapes implied by the DeepIRT+ module (seq, hidden) ---
    seq, hidden = 8, 32
    q = jax.random.normal(keys[0], (seq, hidden), dtype=jnp.float32)
    k = jax.random.normal(keys[1], (seq, hidden), dtype=jnp.float32)
    v = jax.random.normal(keys[2], (seq, hidden), dtype=jnp.float32)
    scale = 1.0 / (hidden ** 0.5)

    out = jax.block_until_ready(scaled_dot_product_attention(q, k, v, scale=scale))
    ref = _reference(q, k, v, scale=scale)
    assert out.shape == (seq, hidden)
    assert jnp.allclose(out, ref, atol=2e-3, rtol=2e-3), \
        float(jnp.max(jnp.abs(out - ref)))

    # --- tiled case: multiple q/kv tiles + masked key padding ---------------
    sq2, sk2, d2, dv2 = 130, 520, 40, 24
    q2 = jax.random.normal(keys[3], (sq2, d2), dtype=jnp.float32)
    k2 = jax.random.normal(keys[4], (sk2, d2), dtype=jnp.float32)
    v2 = jax.random.normal(keys[5], (sk2, dv2), dtype=jnp.float32)
    sc2 = 1.0 / (d2 ** 0.5)
    out2 = jax.block_until_ready(scaled_dot_product_attention(q2, k2, v2, scale=sc2))
    ref2 = _reference(q2, k2, v2, scale=sc2)
    assert out2.shape == (sq2, dv2)
    assert jnp.allclose(out2, ref2, atol=2e-3, rtol=2e-3), \
        float(jnp.max(jnp.abs(out2 - ref2)))

    print("KERNEL_OK")
</pallas_src>

<mosaic_0001>
module attributes {stable_mosaic.version = 11 : i64} {
  func.func @_flash_kernel(%arg0: i32, %arg1: i32, %arg2: memref<8x128xf32, #tpu.memory_space<vmem>>, %arg3: memref<8x128xf32, #tpu.memory_space<vmem>>, %arg4: memref<8x128xf32, #tpu.memory_space<vmem>>, %arg5: memref<8x128xf32, #tpu.memory_space<vmem>>, %arg6: memref<8x128xf32, #tpu.memory_space<vmem>>, %arg7: memref<8x128xf32, #tpu.memory_space<vmem>>, %arg8: memref<8x128xf32, #tpu.memory_space<vmem>>) attributes {dimension_semantics = [#tpu.dimension_semantics<parallel>, #tpu.dimension_semantics<arbitrary>], iteration_bounds = array<i64: 1, 1>, scalar_prefetch = 0 : i64, scratch_operands = 3 : i64, tpu.core_type = #tpu.core_type<tc>, window_params = [{transform_indices = @transform_0, window_bounds = array<i64: 8, 128>}, {transform_indices = @transform_1, window_bounds = array<i64: 8, 128>}, {transform_indices = @transform_2, window_bounds = array<i64: 8, 128>}, {transform_indices = @transform_3, window_bounds = array<i64: 8, 128>}]} {
    %c0_i32 = arith.constant 0 : i32
    %0 = arith.cmpi eq, %arg1, %c0_i32 : i32
    %1 = arith.extui %0 : i1 to i32
    %c0_i32_0 = arith.constant 0 : i32
    %2 = arith.cmpi ne, %1, %c0_i32_0 : i32
    scf.if %2 {
      %cst_24 = arith.constant -1.000000e+30 : f32
      %38 = vector.broadcast %cst_24 : f32 to vector<8x128xf32>
      %c0_25 = arith.constant 0 : index
      %c0_26 = arith.constant 0 : index
      %39 = vector.load %arg6[%c0_25, %c0_26] : memref<8x128xf32, #tpu.memory_space<vmem>>, vector<8x128xf32>
      tpu.vector_store %arg6[%c0_25, %c0_26], %38 {strides = array<i32>} : memref<8x128xf32, #tpu.memory_space<vmem>>, vector<8x128xf32>,
      %cst_27 = arith.constant 0.000000e+00 : f32
      %40 = vector.broadcast %cst_27 : f32 to vector<8x128xf32>
      %c0_28 = arith.constant 0 : index
      %c0_29 = arith.constant 0 : index
      %41 = vector.load %arg7[%c0_28, %c0_29] : memref<8x128xf32, #tpu.memory_space<vmem>>, vector<8x128xf32>
      tpu.vector_store %arg7[%c0_28, %c0_29], %40 {strides = array<i32>} : memref<8x128xf32, #tpu.memory_space<vmem>>, vector<8x128xf32>,
      %cst_30 = arith.constant 0.000000e+00 : f32
      %42 = vector.broadcast %cst_30 : f32 to vector<8x128xf32>
      %c0_31 = arith.constant 0 : index
      %c0_32 = arith.constant 0 : index
      %43 = vector.load %arg8[%c0_31, %c0_32] : memref<8x128xf32, #tpu.memory_space<vmem>>, vector<8x128xf32>
      tpu.vector_store %arg8[%c0_31, %c0_32], %42 {strides = array<i32>} : memref<8x128xf32, #tpu.memory_space<vmem>>, vector<8x128xf32>,
    } else {
    }
    %c0 = arith.constant 0 : index
    %c0_1 = arith.constant 0 : index
    %3 = vector.load %arg2[%c0, %c0_1] : memref<8x128xf32, #tpu.memory_space<vmem>>, vector<8x128xf32>
    %cst = arith.constant 0.176776692 : f32
    %4 = vector.broadcast %cst : f32 to vector<8x128xf32>
    %5 = arith.mulf %3, %4 : vector<8x128xf32>
    %c0_2 = arith.constant 0 : index
    %c0_3 = arith.constant 0 : index
    %6 = vector.load %arg3[%c0_2, %c0_3] : memref<8x128xf32, #tpu.memory_space<vmem>>, vector<8x128xf32>
    %cst_4 = arith.constant dense<0.000000e+00> : vector<8x8xf32>
    %7 = tpu.matmul %5, %6, %cst_4 {dimension_numbers = #tpu.dot_dimension_numbers<[1], [1], [0], [0], [0, 0, 1, 0], [], []>} : vector<8x128xf32>, vector<8x128xf32>, vector<8x8xf32> -> vector<8x8xf32>
    %c0_5 = arith.constant 0 : index
    %c0_6 = arith.constant 0 : index
    %8 = vector.load %arg6[%c0_5, %c0_6] : memref<8x128xf32, #tpu.memory_space<vmem>>, vector<8x128xf32>
    %c0_7 = arith.constant 0 : index
    %c0_8 = arith.constant 0 : index
    %9 = vector.load %arg7[%c0_7, %c0_8] : memref<8x128xf32, #tpu.memory_space<vmem>>, vector<8x128xf32>
    %cst_9 = arith.constant dense<0xFF800000> : vector<8xf32>
    %10 = vector.multi_reduction <maximumf>, %7, %cst_9 [1] : vector<8x8xf32> to vector<8xf32>
    %11 = vector.shape_cast %10 : vector<8xf32> to vector<8x1xf32>
    %12 = vector.broadcast %11 : vector<8x1xf32> to vector<8x128xf32>
    %13 = arith.maximumf %8, %12 : vector<8x128xf32>
    %14 = arith.subf %8, %13 : vector<8x128xf32>
    %15 = math.exp %14 : vector<8x128xf32>
    %16 = vector.extract_strided_slice %13 {offsets = [0, 0], sizes = [8, 1], strides = [1, 1]} : vector<8x128xf32> to vector<8x1xf32>
    %17 = vector.broadcast %16 : vector<8x1xf32> to vector<8x8xf32>
    %18 = arith.subf %7, %17 : vector<8x8xf32>
    %19 = math.exp %18 : vector<8x8xf32>
    %20 = arith.mulf %15, %9 : vector<8x128xf32>
    %cst_10 = arith.constant dense<0.000000e+00> : vector<8xf32>
    %21 = vector.multi_reduction <add>, %19, %cst_10 [1] : vector<8x8xf32> to vector<8xf32>
    %22 = vector.shape_cast %21 : vector<8xf32> to vector<8x1xf32>
    %23 = vector.broadcast %22 : vector<8x1xf32> to vector<8x128xf32>
    %24 = arith.addf %20, %23 : vector<8x128xf32>
    %c0_11 = arith.constant 0 : index
    %c0_12 = arith.constant 0 : index
    %25 = vector.load %arg7[%c0_11, %c0_12] : memref<8x128xf32, #tpu.memory_space<vmem>>, vector<8x128xf32>
    tpu.vector_store %arg7[%c0_11, %c0_12], %24 {strides = array<i32>} : memref<8x128xf32, #tpu.memory_space<vmem>>, vector<8x128xf32>,
    %c0_13 = arith.constant 0 : index
    %c0_14 = arith.constant 0 : index
    %26 = vector.load %arg6[%c0_13, %c0_14] : memref<8x128xf32, #tpu.memory_space<vmem>>, vector<8x128xf32>
    tpu.vector_store %arg6[%c0_13, %c0_14], %13 {strides = array<i32>} : memref<8x128xf32, #tpu.memory_space<vmem>>, vector<8x128xf32>,
    %c0_15 = arith.constant 0 : index
    %c0_16 = arith.constant 0 : index
    %27 = vector.load %arg8[%c0_15, %c0_16] : memref<8x128xf32, #tpu.memory_space<vmem>>, vector<8x128xf32>
    %28 = vector.extract_strided_slice %15 {offsets = [0, 0], sizes = [8, 1], strides = [1, 1]} : vector<8x128xf32> to vector<8x1xf32>
    %29 = vector.broadcast %28 : vector<8x1xf32> to vector<8x128xf32>
    %30 = arith.mulf %27, %29 : vector<8x128xf32>
    %c0_17 = arith.constant 0 : index
    %c0_18 = arith.constant 0 : index
    %31 = vector.load %arg4[%c0_17, %c0_18] : memref<8x128xf32, #tpu.memory_space<vmem>>, vector<8x128xf32>
    %cst_19 = arith.constant dense<0.000000e+00> : vector<8x128xf32>
    %32 = tpu.matmul %19, %31, %cst_19 {dimension_numbers = #tpu.dot_dimension_numbers<[1], [0], [0], [1], [0, 0, 1, 1], [], []>} : vector<8x8xf32>, vector<8x128xf32>, vector<8x128xf32> -> vector<8x128xf32>
    %33 = arith.addf %30, %32 : vector<8x128xf32>
    %c0_20 = arith.constant 0 : index
    %c0_21 = arith.constant 0 : index
    %34 = vector.load %arg8[%c0_20, %c0_21] : memref<8x128xf32, #tpu.memory_space<vmem>>, vector<8x128xf32>
    tpu.vector_store %arg8[%c0_20, %c0_21], %33 {strides = array<i32>} : memref<8x128xf32, #tpu.memory_space<vmem>>, vector<8x128xf32>,
    %c0_i32_22 = arith.constant 0 : i32
    %35 = arith.cmpi eq, %arg1, %c0_i32_22 : i32
    %36 = arith.extui %35 : i1 to i32
    %c0_i32_23 = arith.constant 0 : i32
    %37 = arith.cmpi ne, %36, %c0_i32_23 : i32
    scf.if %37 {
      %c0_24 = arith.constant 0 : index
      %c0_25 = arith.constant 0 : index
      %38 = vector.load %arg7[%c0_24, %c0_25] : memref<8x128xf32, #tpu.memory_space<vmem>>, vector<8x128xf32>
      %39 = vector.extract_strided_slice %38 {offsets = [0, 0], sizes = [8, 1], strides = [1, 1]} : vector<8x128xf32> to vector<8x1xf32>
      %40 = tpu.reciprocal %39 {approx = true} : vector<8x1xf32> -> vector<8x1xf32>
      %c0_26 = arith.constant 0 : index
      %c0_27 = arith.constant 0 : index
      %41 = vector.load %arg8[%c0_26, %c0_27] : memref<8x128xf32, #tpu.memory_space<vmem>>, vector<8x128xf32>
      %42 = vector.broadcast %40 : vector<8x1xf32> to vector<8x128xf32>
      %43 = arith.mulf %41, %42 : vector<8x128xf32>
      %c0_28 = arith.constant 0 : index
      %c0_29 = arith.constant 0 : index
      %44 = vector.load %arg5[%c0_28, %c0_29] : memref<8x128xf32, #tpu.memory_space<vmem>>, vector<8x128xf32>
      tpu.vector_store %arg5[%c0_28, %c0_29], %43 {strides = array<i32>} : memref<8x128xf32, #tpu.memory_space<vmem>>, vector<8x128xf32>,
    } else {
    }
    return
  }
  func.func @transform_0(%arg0: i32, %arg1: i32) -> (i32, i32) {
    %c0_i32 = arith.constant 0 : i32
    %c0_i32_0 = arith.constant 0 : i32
    return %arg0, %c0_i32 : i32, i32
  }
  func.func @transform_1(%arg0: i32, %arg1: i32) -> (i32, i32) {
    %c0_i32 = arith.constant 0 : i32
    %c0_i32_0 = arith.constant 0 : i32
    return %arg1, %c0_i32 : i32, i32
  }
  func.func @transform_2(%arg0: i32, %arg1: i32) -> (i32, i32) {
    %c0_i32 = arith.constant 0 : i32
    %c0_i32_0 = arith.constant 0 : i32
    return %arg1, %c0_i32 : i32, i32
  }
  func.func @transform_3(%arg0: i32, %arg1: i32) -> (i32, i32) {
    %c0_i32 = arith.constant 0 : i32
    %c0_i32_0 = arith.constant 0 : i32
    return %arg0, %c0_i32 : i32, i32
  }
}

</mosaic_0001>

<bundles_post_ra>
// kernel: tpu_custom_call.1
= control target key start
LH: loop header
LB: loop body
LE: loop exit
PB: predicated region body
PF: predicated region fallthrough
CT: control target
= control target key end

     0   :  { %8 = vsyncpa [#allocation6], 0  ;;  %s425_s0 = inlined_call_operand.hbm [shape: f32[8,128], index: 0, kind: input, shape index: {}]   ;;  %s426_s1 = inlined_call_operand.hbm [shape: f32[8,128], index: 1, kind: input, shape index: {}]   ;;  %s427_s2 = inlined_call_operand.hbm [shape: f32[8,128], index: 2, kind: input, shape index: {}]   ;;  %s428_s3 = inlined_call_operand.hbm [shape: f32[8,128], index: 3, kind: output, shape index: {}]  }
   0x1   :  { %9 = vsyncpa [#allocation9], 0 }
   0x2   :  { %10 = vsyncpa [#allocation7], 0  ;;  %s383_s12 = smov [#allocation8]   ;;  %s384_s14 = smov [#allocation5]  }
   0x3   :  { %s27_s13 = sshll.u32 %s383_s12, 4  ;;  %s17_s15 = sshll.u32 %s384_s14, 4  ;;  %s28_s13 = int_to_ptr.vmem [resolvable:$true] %s27_s13  ;;  %s18_s15 = int_to_ptr.vmem [resolvable:$true] %s17_s15 }
   0x4   :  { %s305_s16 = scalar_lea.vmem %s28_s13, 128  ;;  %p310_p1 = scmp.lt.s32.totalorder %s28_s13, %s28_s13 }
   0x5   :  { %p306_p0 = scmp.ne.s32.totalorder %s28_s13, %s305_s16  ;;  %p311_p2 = scmp.lt.s32.totalorder %s305_s16, %s305_s16 }
   0x7   :  { %p312_p3 = por %p311_p2, %p310_p1 }
   0x9   :  { %p313_p4 = pnand %p312_p3, %p306_p0 }
   0xb   :  { %316 = shalt.err (!%p313_p4)
}
   0xc   :  { %30 = dma.hbm_to_vmem [thread:$0]  %s426_s1, 128, %s28_s13, [#allocation9]  }
   0xd   :  { %s325_s19 = scalar_lea.vmem %s18_s15, 128  ;;  %p330_p6 = scmp.lt.s32.totalorder %s18_s15, %s18_s15 }
   0xe   :  { %p326_p5 = scmp.ne.s32.totalorder %s18_s15, %s325_s19  ;;  %p331_p7 = scmp.lt.s32.totalorder %s325_s19, %s325_s19 }
  0x10   :  { %p332_p8 = por %p331_p7, %p330_p6 }
  0x12   :  { %p333_p9 = pnand %p332_p8, %p326_p5 }
  0x14   :  { %336 = shalt.err (!%p333_p9)
}
  0x15   :  { %20 = dma.hbm_to_vmem [thread:$0]  %s425_s0, 128, %s18_s15, [#allocation6]  }
  0x16   :  { %s385_s22 = smov [#allocation10]  }
  0x17   :  { %s37_s23 = sshll.u32 %s385_s22, 4  ;;  %s38_s23 = int_to_ptr.vmem [resolvable:$true] %s37_s23 }
  0x18   :  { %s345_s24 = scalar_lea.vmem %s38_s23, 128  ;;  %p350_p11 = scmp.lt.s32.totalorder %s38_s23, %s38_s23 }
  0x19   :  { %p346_p10 = scmp.ne.s32.totalorder %s38_s23, %s345_s24  ;;  %p351_p12 = scmp.lt.s32.totalorder %s345_s24, %s345_s24 }
  0x1b   :  { %p352_p13 = por %p351_p12, %p350_p11 }
  0x1d   :  { %p353_p0 = pnand %p352_p13, %p346_p10 }
  0x1f   :  { %356 = shalt.err (!%p353_p0)
}
  0x20   :  { %40 = dma.hbm_to_vmem [thread:$0]  %s427_s2, 128, %s38_s23, [#allocation9]  }
  0x21   :  { %377 = dma.done.wait [#allocation6], 128  }
  0x22   :  { %378 = vsyncadd [#allocation6], 4294967168 }
  0x23   :  { %379 = dma.done.wait [#allocation9], 256  }
  0x24   :  { %380 = vsyncadd [#allocation9], 4294967040  ;;  %v386_v0 = vmov 0.0   ;;  %vm387_vm0 = vmmov 0   ;;  %v59_v1 = vld [vmem:[#allocation8] sm:$0xff]  ;;  %v57_v2 = vld [vmem:[#allocation5] sm:$0xff] }
  0x25   :  { %272 = vmatprep.subr.mxu0 %v386_v0  ;;  %274 = vmatprep.mubr.msk.f32.mxu0 %vm387_vm0, %v386_v0  ;;  %v58_v3 = vmul.f32 0.17677669, %v57_v2  ;;  %vm132_vm1 = vcmask 64512   ;;  %v388_v7 = vmov 0   ;;  %v162_v10 = vld [vmem:[#allocation10] sm:$0xff]  ;;  %s389_s0 = smov [#allocation11]  }
  0x26   :  { %277 = vmatprep.subr.mxu1 %v386_v0  ;;  %279 = vmatprep.mubr.msk.f32.mxu1 %vm387_vm0, %v386_v0  ;;  %s257_s2 = sshll.u32 %s389_s0, 4  ;;  %s258_s2 = int_to_ptr.vmem [resolvable:$true] %s257_s2 }
  0x27   :  { %273 = vmatpush3.xpose.msra.mxu0 %v59_v1  ;;  %289 = vset.pattern.permute.xlu0 %v388_v7  ;;  %s357_s26 = scalar_lea.vmem %s258_s2, 128  ;;  %p362_p2 = scmp.lt.s32.totalorder %s258_s2, %s258_s2 }
  0x28   :  { %290 = vset.pattern.permute.xlu1 %v388_v7  ;;  %278 = vmatpush3.msra.mxu1 %v162_v10  ;;  %p358_p1 = scmp.ne.s32.totalorder %s258_s2, %s357_s26  ;;  %p363_p3 = scmp.lt.s32.totalorder %s357_s26, %s357_s26 }
  0x2a   :  { %275 = vmatmul.mubr.f32.vlgmr.msra.gmra.mxu0 %v58_v3  ;;  %p364_p4 = por %p363_p3, %p362_p2 }
  0x2c   :  { %p365_p5 = pnand %p364_p4, %p358_p1 }
  0xea   :  { %v126_v4 = vpop.f32.mrf.mxu0 }
  0xeb   :  { %v133_v5 = vsel %vm132_vm1, %v126_v4, -inf }
  0xec   :  { %134 = vmax.xlane.f32.xlu0 %v133_v5  ;;  %v276_v6 = vpop.f32.mrf.mxu0 }
 0x175   :  { %v135_v8 = vpop.xlane.xlu0 %134 }
 0x176   :  { %v136_v9 = vmax.f32 %v135_v8, -1e+30 }
 0x178   :  { %142 = vperm.xlu0 %289, %v136_v9   ;;  %v137_v14 = vsub.f32 -1e+30, %v136_v9 }
 0x17a   :  { %v138_v16 = vmul.f32 1.442695, %v137_v14 }
 0x1f3   :  { %v143_v11 = vpop.permute.xlu0 %142 }
 0x1f4   :  { %v145_v12 = vsub.f32 %v126_v4, %v143_v11 }
 0x1f6   :  { %v146_v13 = vmul.f32 1.442695, %v145_v12 }
 0x1f8   :  { %291 = vpow2.f32 %v146_v13 }
 0x1f9   :  { %293 = vpow2.f32 %v138_v16 }
 0x205   :  { %v292_v15 = vpop.eup %291 }
 0x206   :  { %280 = vmatmul.mubr.msk.f32.vlgmr.msra.gmra.mxu1 %vm132_vm1, %v292_v15  ;;  %v149_v17 = vsel %vm132_vm1, %v292_v15, 0.0  ;;  %v294_v18 = vpop.eup %293 }
 0x207   :  { %150 = vadd.xlane.f32.xlu1 %v149_v17  ;;  %v148_v19 = vmul.f32 0.0, %v294_v18 }
 0x218   :  { %158 = vperm.xlu1 %290, %v294_v18  }
 0x290   :  { %v151_v20 = vpop.xlane.xlu1 %150 }
 0x291   :  { %v152_v21 = vadd.f32 %v151_v20, %v148_v19 }
 0x293   :  { %295 = vrcp.f32 %v152_v21 }
 0x294   :  { %v159_v25 = vpop.permute.xlu1 %158 }
 0x295   :  { %v161_v26 = vmul.f32 0.0, %v159_v25 }
 0x2a0   :  { %v296_v22 = vpop.eup %295 }
 0x2a1   :  { %246 = vperm.xlu1 %290, %v296_v22  }
 0x2c6   :  { %v232_v23 = vpop.f32.mrf.mxu1 }
 0x2c7   :  { %v236_v27 = vadd.f32 %v232_v23, %v161_v26 }
 0x2c8   :  { %v281_v24 = vpop.f32.mrf.mxu1 }
 0x31c   :  { %v247_v28 = vpop.permute.xlu1 %246 }
 0x31d   :  { %v249_v29 = vmul.f32 %v247_v28, %v236_v27 }
 0x31f   :  { %250 = vst [vmem:[#allocation11] sm:$0xff] %v249_v29 }
 0x320   :  { %368 = shalt.err (!%p365_p5)
}
 0x321   :  { %260 = dma.vmem_to_hbm [thread:$0]  %s258_s2, 128, %s428_s3, [#allocation7]  }
 0x322   :  { %381 = dma.done.wait [#allocation7], 128  }
 0x323   :  { %382 = vsyncadd [#allocation7], 4294967168 }
 0x324   :  { %264 = vsyncpa [#allocation6], 1 }
 0x325   :  { %265 = vsyncpa [#allocation9], 1 }
 0x326   :  { %266 = vsyncpa [#allocation7], 1 }

</bundles_post_ra>
